<compile_context>
chip_gen: v6e
topology: v6e:2x2x1
jax: 0.10.0
libtpu: 0.0.40
codegen_flags: <defaults>
</compile_context>

<pallas_src>
import jax
import jax.numpy as jnp
from jax.experimental import pallas as pl
from jax.experimental.pallas import tpu as pltpu


# ----------------------------------------------------------------------------- #
# helpers
# ----------------------------------------------------------------------------- #
def _round_up(x, m):
    return ((x + m - 1) // m) * m


def _cdiv(a, b):
    return -(-a // b)


def _sublane(itemsize):
    # minimum sublane tile for the dtype: f32 -> 8, bf16 -> 16, int8 -> 32
    return max(8, 32 // max(1, itemsize))


def _block_bytes(rows, cols, itemsize):
    """VMEM footprint of one (rows, cols) block, lane (128) / sublane padded."""
    return _round_up(rows, _sublane(itemsize)) * _round_up(cols, 128) * itemsize


def _vmem_budget_bytes():
    """Usable per-core VMEM budget, derived per generation."""
    try:
        cap = int(pltpu.get_tpu_info().vmem_capacity_bytes)
    except Exception:
        cap = 64 << 20                      # conservative (v7x-sized) fallback
    if cap <= (64 << 20):
        return (cap * 3) // 4               # v7x: leave room for Mosaic scratch
    return (cap * 4) // 5                   # v5e / v6e: ~100 MiB usable


# ----------------------------------------------------------------------------- #
# kernels
# ----------------------------------------------------------------------------- #
def _sentence_embedding_kernel(x_ref, w_ref, b_ref, m_ref, o_ref):
    # x_ref: (tm, H_in)  w_ref: (H_in, tn)  b_ref: (1, tn)  m_ref: (tm, 1)
    y = jnp.dot(x_ref[...], w_ref[...], preferred_element_type=jnp.float32)
    # mask (rows NOT in mask_nonzero -> exactly 0) AFTER the bias, then LeakyReLU.
    # LeakyReLU(0) == 0, so this matches the reference `y - masked_clone` trick.
    t = (y + b_ref[...]) * m_ref[...]
    o_ref[...] = jnp.maximum(t, jnp.float32(0.01) * t).astype(o_ref.dtype)


def _sentence_embedding_kernel_ktiled(x_ref, w_ref, b_ref, m_ref, o_ref, acc_ref):
    # K-tiled variant: x_ref (tm, tk), w_ref (tk, tn); accumulate over grid axis 2.
    k = pl.program_id(2)

    @pl.when(k == 0)
    def _():
        acc_ref[...] = jnp.zeros_like(acc_ref)

    acc_ref[...] += jnp.dot(x_ref[...], w_ref[...],
                            preferred_element_type=jnp.float32)

    @pl.when(k == pl.num_programs(2) - 1)
    def _():
        t = (acc_ref[...] + b_ref[...]) * m_ref[...]
        o_ref[...] = jnp.maximum(t, jnp.float32(0.01) * t).astype(o_ref.dtype)


# ----------------------------------------------------------------------------- #
# wrapper
# ----------------------------------------------------------------------------- #
def sentence_embedding(x, weight, bias, mask_nonzero, *, tm=None, tn=None, tk=None):
    """x: (B, S, H_in); weight: (H_out, H_in); bias: (H_out,);
    mask_nonzero: (batch_idx, row_idx) integer arrays of positions to KEEP.
    tm / tn / tk are optional tile overrides (None = auto)."""
    B, S, H_in = x.shape
    H_out = weight.shape[0]
    M = B * S
    itemsize = jnp.dtype(x.dtype).itemsize
    row_align = _sublane(itemsize)
    budget = _vmem_budget_bytes()

    # ---- K (contraction) strategy -------------------------------------------
    if tk is not None:
        k_tiled = True
        tk = _round_up(tk, 128)
    else:
        probe_tm = min(_round_up(M, row_align), 256)
        probe_tn = min(512, _round_up(H_out, 128))
        full_k_cost = (2 * _block_bytes(probe_tm, H_in, itemsize)
                       + 2 * _block_bytes(H_in, probe_tn, itemsize)
                       + 2 * _block_bytes(probe_tm, probe_tn, itemsize))
        k_tiled = full_k_cost > budget
        tk = 512 if k_tiled else H_in
    H_in_pad = _round_up(H_in, tk) if k_tiled else H_in
    grid_k = H_in_pad // tk if k_tiled else 1

    # ---- N (output-column) strategy ------------------------------------------
    if tn is not None:
        tn = min(_round_up(tn, 128), _round_up(H_out, 128))
        H_out_pad = _round_up(H_out, tn)
        grid_n = H_out_pad // tn
    elif (not k_tiled) and _block_bytes(H_in, H_out, itemsize) <= budget // 2:
        # full weight resident in VMEM -> fetched from HBM exactly once
        tn, H_out_pad, grid_n = H_out, H_out, 1
    elif H_out <= 512:
        tn, H_out_pad, grid_n = H_out, H_out, 1
    else:
        tn = 512
        if not k_tiled:
            while tn > 128 and 2 * _block_bytes(H_in, tn, itemsize) > budget // 2:
                tn //= 2
        H_out_pad = _round_up(H_out, tn)
        grid_n = H_out_pad // tn

    w_bufs = 1 if (grid_n == 1 and not k_tiled) else 2   # grid-constant -> 1 buf
    b_bufs = 1 if grid_n == 1 else 2

    # ---- M (row) strategy -----------------------------------------------------
    if tm is None:
        tm = 1024 if H_in_pad <= 256 else 512             # amortize step overhead
    tm = _round_up(max(row_align, min(tm, _round_up(M, row_align))), row_align)

    fixed = (w_bufs * _block_bytes(tk, tn, itemsize)
             + b_bufs * _block_bytes(1, tn, itemsize))

    def _tile_bytes(rows):
        per = (2 * _block_bytes(rows, tk, itemsize)        # x  (double-buffered)
               + 2 * _block_bytes(rows, 1, 4)              # keep mask (f32)
               + 2 * _block_bytes(rows, tn, itemsize))     # out
        if k_tiled:
            per += _block_bytes(rows, tn, 4)               # f32 accumulator
        return per

    while tm > row_align and fixed + _tile_bytes(tm) > budget:
        tm = _round_up(tm // 2, row_align)

    def _snap(t):
        # prefer a row tile that divides M exactly (no host-side pad / slice copy)
        if M % t == 0:
            return t
        d = t
        while d >= max(row_align, t // 2):
            if M % d == 0:
                return d
            d -= row_align
        return t

    tm = _snap(tm)
    grid_m = _cdiv(M, tm)
    # ensure the "parallel" row axis has >= 2 steps so megacore / v7x's two
    # TensorCores both get work; harmless on single-core parts.
    if grid_m == 1 and M >= 2 * row_align:
        tm = _snap(_round_up(_round_up(M, row_align) // 2, row_align))
        grid_m = _cdiv(M, tm)
    M_pad = grid_m * tm

    # ---- operand prep (pad only when unavoidable) -----------------------------
    x_flat = x.reshape(M, H_in)
    w_t = weight.T                          # (H_in, H_out)
    b2 = bias.reshape(1, H_out)

    batch_idx, row_idx = mask_nonzero
    keep = jnp.zeros((B, S), dtype=jnp.float32).at[
        jnp.asarray(batch_idx), jnp.asarray(row_idx)].set(1.0)
    keep_flat = keep.reshape(M, 1)

    if M_pad != M:
        x_flat = jnp.pad(x_flat, ((0, M_pad - M), (0, 0)))
        keep_flat = jnp.pad(keep_flat, ((0, M_pad - M), (0, 0)))
    if H_in_pad != H_in:
        x_flat = jnp.pad(x_flat, ((0, 0), (0, H_in_pad - H_in)))
        w_t = jnp.pad(w_t, ((0, H_in_pad - H_in), (0, 0)))
    if H_out_pad != H_out:
        w_t = jnp.pad(w_t, ((0, 0), (0, H_out_pad - H_out)))
        b2 = jnp.pad(b2, ((0, 0), (0, H_out_pad - H_out)))

    vmem_est = fixed + _tile_bytes(tm)
    vmem_limit = int(min(budget, max(vmem_est * 5 // 4 + (2 << 20), 16 << 20)))

    # ---- specs + call ----------------------------------------------------------
    if not k_tiled:
        if grid_n == 1:
            # grid-constant weight & bias: single buffer (no wasted 2nd VMEM copy)
            w_spec = pl.BlockSpec((H_in, tn), lambda i, j: (0, j),
                                  pipeline_mode=pl.Buffered(1))
            b_spec = pl.BlockSpec((1, tn), lambda i, j: (0, j),
                                  pipeline_mode=pl.Buffered(1))
        else:
            w_spec = pl.BlockSpec((H_in, tn), lambda i, j: (0, j))
            b_spec = pl.BlockSpec((1, tn), lambda i, j: (0, j))
        grid = (grid_m, grid_n)
        in_specs = [pl.BlockSpec((tm, H_in), lambda i, j: (i, 0)),
                    w_spec, b_spec,
                    pl.BlockSpec((tm, 1), lambda i, j: (i, 0))]
        out_spec = pl.BlockSpec((tm, tn), lambda i, j: (i, j))
        scratch = []
        kernel = _sentence_embedding_kernel
        semantics = ("parallel", "parallel")
    else:
        grid = (grid_m, grid_n, grid_k)
        if grid_n == 1:
            b_spec = pl.BlockSpec((1, tn), lambda i, j, k: (0, j),
                                  pipeline_mode=pl.Buffered(1))
        else:
            b_spec = pl.BlockSpec((1, tn), lambda i, j, k: (0, j))
        in_specs = [pl.BlockSpec((tm, tk), lambda i, j, k: (i, k)),
                    pl.BlockSpec((tk, tn), lambda i, j, k: (k, j)),
                    b_spec,
                    pl.BlockSpec((tm, 1), lambda i, j, k: (i, 0))]
        out_spec = pl.BlockSpec((tm, tn), lambda i, j, k: (i, j))
        scratch = [pltpu.VMEM((tm, tn), jnp.float32)]
        kernel = _sentence_embedding_kernel_ktiled
        semantics = ("parallel", "parallel", "arbitrary")

    out_flat = pl.pallas_call(
        kernel,
        out_shape=jax.ShapeDtypeStruct((M_pad, H_out_pad), x.dtype),
        grid_spec=pltpu.PrefetchScalarGridSpec(
            num_scalar_prefetch=0,
            grid=grid,
            in_specs=in_specs,
            out_specs=out_spec,
            scratch_shapes=scratch),
        compiler_params=pltpu.CompilerParams(
            dimension_semantics=semantics,
            vmem_limit_bytes=vmem_limit),
    )(x_flat, w_t, b2, keep_flat)

    out = out_flat
    if H_out_pad != H_out:
        out = out[:, :H_out]
    if M_pad != M:
        out = out[:M]
    return out.reshape(B, S, H_out)


# ----------------------------------------------------------------------------- #
# self-test
# ----------------------------------------------------------------------------- #
if __name__ == "__main__":
    key = jax.random.PRNGKey(0)

    def ref_forward(x, weight, bias, mask_nonzero):
        # Pure-JAX mirror of the PyTorch forward semantics.
        y = jnp.einsum("bsi,oi->bso", x, weight) + bias
        b_idx, r_idx = mask_nonzero
        clone = y.at[b_idx, r_idx, :].set(0.0)
        y = y - clone
        return jnp.where(y > 0, y, 0.01 * y)

    # ---- case 1: small shapes matching the module's intent --------------------
    B, S, H_in, H_out = 2, 8, 32, 32
    k1, k2, k3 = jax.random.split(key, 3)
    bound = 1.0 / (H_in ** 0.5)
    x = jax.random.normal(k1, (B, S, H_in), dtype=jnp.float32)
    weight = jax.random.uniform(k2, (H_out, H_in), minval=-bound, maxval=bound,
                                dtype=jnp.float32)
    bias = jax.random.uniform(k3, (H_out,), minval=-bound, maxval=bound,
                              dtype=jnp.float32)
    batch_idx = jnp.array([0, 0, 0, 1, 1, 1, 1], dtype=jnp.int32)
    row_idx = jnp.array([0, 1, 2, 0, 1, 3, 5], dtype=jnp.int32)

    out = jax.block_until_ready(sentence_embedding(x, weight, bias,
                                                   (batch_idx, row_idx)))
    ref = ref_forward(x, weight, bias, (batch_idx, row_idx))
    assert out.shape == (B, S, H_out)
    assert jnp.allclose(out, ref, atol=1e-5, rtol=1e-5)

    # ---- case 2: row-tail padding, unpadded small H_out, grid_m split ----------
    B2, S2, H_in2, H_out2 = 3, 50, 64, 96
    k4, k5, k6 = jax.random.split(jax.random.PRNGKey(0), 3)
    bound2 = 1.0 / (H_in2 ** 0.5)
    x2 = jax.random.normal(k4, (B2, S2, H_in2), dtype=jnp.float32)
    weight2 = jax.random.uniform(k5, (H_out2, H_in2), minval=-bound2, maxval=bound2,
                                 dtype=jnp.float32)
    bias2 = jax.random.uniform(k6, (H_out2,), minval=-bound2, maxval=bound2,
                               dtype=jnp.float32)
    batch_idx2 = jnp.repeat(jnp.arange(B2, dtype=jnp.int32), 20)
    row_idx2 = jnp.tile(jnp.arange(20, dtype=jnp.int32) * 2, B2)

    out2 = jax.block_until_ready(sentence_embedding(x2, weight2, bias2,
                                                    (batch_idx2, row_idx2)))
    ref2 = ref_forward(x2, weight2, bias2, (batch_idx2, row_idx2))
    assert out2.shape == (B2, S2, H_out2)
    assert jnp.allclose(out2, ref2, atol=1e-4, rtol=1e-4)

    # ---- case 3: force the K-tiled + N-tiled path (exercised at small shapes) --
    B3, S3, H_in3, H_out3 = 2, 64, 272, 384
    k7, k8, k9 = jax.random.split(jax.random.PRNGKey(1), 3)
    bound3 = 1.0 / (H_in3 ** 0.5)
    x3 = jax.random.normal(k7, (B3, S3, H_in3), dtype=jnp.float32)
    weight3 = jax.random.uniform(k8, (H_out3, H_in3), minval=-bound3, maxval=bound3,
                                 dtype=jnp.float32)
    bias3 = jax.random.uniform(k9, (H_out3,), minval=-bound3, maxval=bound3,
                               dtype=jnp.float32)
    batch_idx3 = jnp.repeat(jnp.arange(B3, dtype=jnp.int32), 30)
    row_idx3 = jnp.tile(jnp.arange(30, dtype=jnp.int32), B3)

    out3 = jax.block_until_ready(
        sentence_embedding(x3, weight3, bias3, (batch_idx3, row_idx3),
                           tn=128, tk=128))
    ref3 = ref_forward(x3, weight3, bias3, (batch_idx3, row_idx3))
    assert out3.shape == (B3, S3, H_out3)
    assert jnp.allclose(out3, ref3, atol=1e-4, rtol=1e-4)

    print("KERNEL_OK")
</pallas_src>

<mosaic_0001>
module attributes {stable_mosaic.version = 11 : i64} {
  func.func @_sentence_embedding_kernel(%arg0: i32, %arg1: i32, %arg2: memref<8x32xf32, #tpu.memory_space<vmem>>, %arg3: memref<32x32xf32, #tpu.memory_space<vmem>>, %arg4: memref<1x32xf32, #tpu.memory_space<vmem>>, %arg5: memref<8x1xf32, #tpu.memory_space<vmem>>, %arg6: memref<8x32xf32, #tpu.memory_space<vmem>>) attributes {dimension_semantics = [#tpu.dimension_semantics<parallel>, #tpu.dimension_semantics<parallel>], iteration_bounds = array<i64: 2, 1>, scalar_prefetch = 0 : i64, scratch_operands = 0 : i64, tpu.core_type = #tpu.core_type<tc>, window_params = [{transform_indices = @transform_0, window_bounds = array<i64: 8, 32>}, {pipeline_mode = #tpu.pipeline_mode<synchronous>, transform_indices = @transform_1, window_bounds = array<i64: 32, 32>}, {pipeline_mode = #tpu.pipeline_mode<synchronous>, transform_indices = @transform_2, window_bounds = array<i64: 1, 32>}, {transform_indices = @transform_3, window_bounds = array<i64: 8, 1>}, {transform_indices = @transform_4, window_bounds = array<i64: 8, 32>}]} {
    %c0 = arith.constant 0 : index
    %c0_0 = arith.constant 0 : index
    %0 = vector.load %arg2[%c0, %c0_0] : memref<8x32xf32, #tpu.memory_space<vmem>>, vector<8x32xf32>
    %c0_1 = arith.constant 0 : index
    %c0_2 = arith.constant 0 : index
    %1 = vector.load %arg3[%c0_1, %c0_2] : memref<32x32xf32, #tpu.memory_space<vmem>>, vector<32x32xf32>
    %cst = arith.constant dense<0.000000e+00> : vector<8x32xf32>
    %2 = tpu.matmul %0, %1, %cst {dimension_numbers = #tpu.dot_dimension_numbers<[1], [0], [0], [1], [0, 0, 1, 1], [], []>} : vector<8x32xf32>, vector<32x32xf32>, vector<8x32xf32> -> vector<8x32xf32>
    %c0_3 = arith.constant 0 : index
    %c0_4 = arith.constant 0 : index
    %3 = vector.load %arg4[%c0_3, %c0_4] : memref<1x32xf32, #tpu.memory_space<vmem>>, vector<1x32xf32>
    %4 = vector.broadcast %3 : vector<1x32xf32> to vector<8x32xf32>
    %5 = arith.addf %2, %4 : vector<8x32xf32>
    %c0_5 = arith.constant 0 : index
    %c0_6 = arith.constant 0 : index
    %6 = vector.load %arg5[%c0_5, %c0_6] : memref<8x1xf32, #tpu.memory_space<vmem>>, vector<8x1xf32>
    %7 = vector.broadcast %6 : vector<8x1xf32> to vector<8x32xf32>
    %8 = arith.mulf %5, %7 : vector<8x32xf32>
    %cst_7 = arith.constant 0.00999999977 : f32
    %9 = vector.broadcast %cst_7 : f32 to vector<8x32xf32>
    %10 = arith.mulf %9, %8 : vector<8x32xf32>
    %11 = arith.maximumf %8, %10 : vector<8x32xf32>
    %c0_8 = arith.constant 0 : index
    %c0_9 = arith.constant 0 : index
    %12 = vector.load %arg6[%c0_8, %c0_9] : memref<8x32xf32, #tpu.memory_space<vmem>>, vector<8x32xf32>
    tpu.vector_store %arg6[%c0_8, %c0_9], %11 {strides = array<i32>} : memref<8x32xf32, #tpu.memory_space<vmem>>, vector<8x32xf32>,
    return
  }
  func.func @transform_0(%arg0: i32, %arg1: i32) -> (i32, i32) {
    %c0_i32 = arith.constant 0 : i32
    %c0_i32_0 = arith.constant 0 : i32
    return %arg0, %c0_i32 : i32, i32
  }
  func.func @transform_1(%arg0: i32, %arg1: i32) -> (i32, i32) {
    %c0_i32 = arith.constant 0 : i32
    %c0_i32_0 = arith.constant 0 : i32
    return %c0_i32, %arg1 : i32, i32
  }
  func.func @transform_2(%arg0: i32, %arg1: i32) -> (i32, i32) {
    %c0_i32 = arith.constant 0 : i32
    %c0_i32_0 = arith.constant 0 : i32
    return %c0_i32, %arg1 : i32, i32
  }
  func.func @transform_3(%arg0: i32, %arg1: i32) -> (i32, i32) {
    %c0_i32 = arith.constant 0 : i32
    %c0_i32_0 = arith.constant 0 : i32
    return %arg0, %c0_i32 : i32, i32
  }
  func.func @transform_4(%arg0: i32, %arg1: i32) -> (i32, i32) {
    %c0_i32 = arith.constant 0 : i32
    return %arg0, %arg1 : i32, i32
  }
}

</mosaic_0001>

<bundles_post_ra>
// kernel: tpu_custom_call.1
= control target key start
LH: loop header
LB: loop body
LE: loop exit
PB: predicated region body
PF: predicated region fallthrough
CT: control target
= control target key end

     0   :  { %9 = vsyncpa [#allocation3], 0  ;;  %s850_s0 = inlined_call_operand.vmem [shape: f32[16,32], index: 0, kind: input, shape index: {}]   ;;  %s851_s1 = inlined_call_operand.hbm [shape: f32[32,32], index: 1, kind: input, shape index: {}]   ;;  %s852_s2 = inlined_call_operand.vmem [shape: f32[1,32], index: 2, kind: input, shape index: {}]   ;;  %s853_s3 = inlined_call_operand.vmem [shape: f32[16,1], index: 3, kind: input, shape index: {}]   ;;  %s854_s4 = inlined_call_operand.hbm [shape: f32[16,32], index: 4, kind: output, shape index: {}]  }
   0x1   :  { %10 = vsyncpa [#allocation4], 0 }
   0x2   :  { %12 = vsyncpa [#allocation4 + $0x1], 0  ;;  %s722_s15 = smov 0   ;;  %s724_s16 = smov 0  }
   0x3   :  { %s726_s17 = smov 0   ;;  %s728_s18 = smov 0  }
   0x4   :  { %s730_s19 = smov 0   ;;  %s732_s20 = smov 0  }
   0x5 LB: > { %s477_s21 = sadd.s32 4294967295, %s688_s20   ;;  %s478_s22 = sadd.s32 4294967294, %s688_s20   ;;  %s688_s20 = sphi %s732_s20, %s18_s20   ;;  %s684_s19 = sphi %s730_s19, %s863_s19   ;;  %s680_s18 = sphi %s728_s18, %s862_s18   ;;  %s676_s17 = sphi %s726_s17, %s861_s17   ;;  %s672_s16 = sphi %s724_s16, %s860_s16   ;;  %s668_s15 = sphi %s722_s15, %s859_s15  }
   0x6   : > { %s30_s23 = sadd.s32 1, %s684_s19  ;;  %s143_s24 = sadd.s32 1, %s676_s17 }
   0x7   : > { %p32_p0 = scmp.ge.s32.totalorder %s30_s23, 2  ;;  %p153_p1 = scmp.ne.s32.totalorder %s676_s17, %s672_s16 }
   0x8   : > { %p154_p2 = scmp.eq.s32.totalorder %s477_s21, 1  ;;  %p159_p3 = scmp.ne.s32.totalorder %s672_s16, %s668_s15 }
   0x9   : > { %s865_s23 = smov (%p32_p0, %s30_s23), 0  ;;  %p160_p5 = scmp.eq.s32.totalorder %s478_s22, 1 }
   0xa   : > { %p762_p4 = por %p154_p2, %p153_p1  ;;  %s138_s26 = ssub.s32 %s684_s19, %s865_s23 }
   0xb   : > { %p479_p6 = scmp.ge.s32.totalorder %s688_s20, 1  ;;  %p141_p7 = scmp.eq.s32.totalorder %s138_s26, 0 }
   0xc   : > { %p769_p8 = por %p160_p5, %p159_p3  ;;  %p167_p9 = scmp.lt.s32.totalorder %s688_s20, 3 }
   0xd   : > { %s775_s28 = scalar_select %p141_p7, %s676_s17, %s143_s24  }
   0xe   : > { %p777_p10 = pnand %p479_p6, %p167_p9  ;;  %p781_p11 = scmp.eq.s32.totalorder %s477_s21, 0 }
   0xf   : > { %s690_s5 = smov [#allocation2]  }
  0x10   : > { %p516_p12 = pneg %p777_p10  ;;  %s181_s6 = sshll.u32 %s690_s5, 4  ;;  %s182_s6 = int_to_ptr.vmem [resolvable:$true] %s181_s6 }
  0x11   : > { %s593_s7 = scalar_lea.vmem %s182_s6, 512  ;;  %p601_p5 = scmp.lt.s32.totalorder %s182_s6, %s182_s6 }
  0x12   : > { %p517_p13 = pnand %p781_p11, %p516_p12  ;;  %p594_p1 = scmp.ne.s32.totalorder %s182_s6, %s593_s7 }
  0x13   : > { %p602_p6 = scmp.lt.s32.totalorder %s593_s7, %s593_s7 }
  0x14   : > { %p584_p0 = pneg %p517_p13 }
  0x15   : > { %p603_p7 = por %p602_p6, %p601_p5 }
  0x16   : > { %p596_p2 = pnand %p594_p1, %p584_p0 }
  0x18   : > { %p597_p3 = pneg %p596_p2 }
  0x1a   : > { %p604_p9 = pnand %p603_p7, %p597_p3 }
  0x1c   : > { %607 = shalt.err (!%p604_p9)
}
  0x1d   : > { %s691_s8 = smov 128   ;;  %s692_s9 = smov 8  }
  0x1e   : > { %519 = dma.hbm_to_vmem [thread:$0]  (!%p517_p13), %s851_s1, 512, %s182_s6, [#allocation3], %s691_s8, %s691_s8, %s692_s9  }
  0x1f   : > { %217 = sbr.rel (%p777_p10) target bundleno = 260 (0x104), region = 36 }
  0x24   : > { %659 = dma.done.wait (%p781_p11), [#allocation3], 512  }
  0x25   : > { %661 = vsyncadd (%p781_p11), [#allocation3], 4294966784  ;;  %p249_p12 = scmp.lt.s32.totalorder %s680_s18, 1  ;;  %v693_v0 = vmov 0.0   ;;  %vm694_vm0 = vmmov 0   ;;  %v695_v1 = vmov 0  }
  0x26   : > { %499 = vmatprep.subr.mxu0 %v693_v0  ;;  %507 = vmatprep.mubr.msk.f32.mxu0 %vm694_vm0, %v693_v0  ;;  %v264_v2 = vld [vmem:[#allocation2 + $0x18] sm:$0xff]  ;;  %v263_v3 = vld [vmem:[#allocation2 + $0x10] sm:$0xff]  ;;  %v262_v5 = vld [vmem:[#allocation2 + $0x8] sm:$0xff]  ;;  %vm272_vm1 = vcmask 261120   ;;  %s246_s30 = sand.u32 1, %s672_s16   ;;  %s491_s8 = sshll.u32 %s680_s18, 7 }
  0x27   : > { %s250_s12 = scalar_select %p249_p12, %s680_s18, 1  ;;  %581 = vset.pattern.permute.xlu0 %v695_v1  ;;  %500 = vmatpush3.msra.mxu0 %v264_v2  ;;  %v261_v6 = vld [vmem:[#allocation2] sm:$0xff] }
  0x28   : > { %501 = vmatprep.subr.mxu0 %v693_v0  ;;  %v488_v8 = vld [vmem:[%s852_s2] ss:$0 sm:$0xff]  ;;  %s485_s7 = sshll.u32 %s246_s30, 3  ;;  %s357_s14 = scalar_lea.sflag [#allocation4], %s246_s30 }
  0x29   : > { %s486_s13 = sshll.u32 %s250_s12, 3  ;;  %502 = vmatpush3.msra.mxu0 %v263_v3  ;;  %s248_s9 = scalar_lea.vmem [#allocation5], %s485_s7 }
  0x2a   : > { %s259_s22 = scalar_lea.vmem %s853_s3, %s486_s13  ;;  %s252_s29 = scalar_lea.vmem %s850_s0, %s486_s13  ;;  %503 = vmatprep.subr.mxu0 %v693_v0 }
  0x2b   : > { %v346_v4 = vld [vmem:[%s259_s22] sm:$0xff]  ;;  %504 = vmatpush3.msra.mxu0 %v262_v5  ;;  %s371_s10 = sshll.u32 %s248_s9, 4  ;;  %s369_s13 = scalar_lea.hbm %s854_s4, %s491_s8  ;;  %s372_s10 = int_to_ptr.vmem [resolvable:$true] %s371_s10 }
  0x2c   : > { %349 = vperm.xlu0 %581, %v346_v4   ;;  %v260_v7 = vld [vmem:[%s252_s29] sm:$0xff]  ;;  %505 = vmatprep.subr.mxu0 %v693_v0  ;;  %s608_s21 = scalar_lea.vmem %s372_s10, 128  ;;  %s696_s22 = smov [#allocation5]  }
  0x2d   : > { %506 = vmatpush3.msra.mxu0 %v261_v6  ;;  %p609_p10 = scmp.ne.s32.totalorder %s372_s10, %s608_s21  ;;  %s612_s24 = sshll.u32 %s696_s22, 4  ;;  %s613_s24 = int_to_ptr.vmem [resolvable:$false] %s612_s24 }
  0x2e   : > { %508 = vmatmul.mubr.msk.f32.vlgmr.msra.gmra.mxu0 %vm272_vm1, %v260_v7  ;;  %s614_s18 = scalar_lea.vmem %s613_s24, 256  ;;  %p615_p0 = scmp.lt.s32.totalorder %s372_s10, %s613_s24 }
  0x2f   : > { %p610_p11 = pnand %p609_p10, %p762_p4  ;;  %p616_p1 = scmp.lt.s32.totalorder %s614_s18, %s608_s21 }
  0x31   : > { %p611_p13 = pneg %p610_p11  ;;  %p617_p2 = por %p616_p1, %p615_p0 }
  0x33   : > { %p618_p3 = pnand %p617_p2, %p611_p13 }
  0xa7   : > { %v350_v10 = vpop.permute.xlu0 %349 }
  0xee   : > { %v342_v9 = vpop.f32.mrf.mxu0 }
  0xef   : > { %v343_v11 = vadd.f32 %v488_v8, %v342_v9 }
  0xf0   : > { %v509_v12 = vpop.f32.mrf.mxu0 }
  0xf1   : > { %v352_v13 = vmul.f32 %v350_v10, %v343_v11 }
  0xf3   : > { %v353_v14 = vmul.f32 0.01, %v352_v13 }
  0xf5   : > { %v354_v15 = vmax.f32 %v352_v13, %v353_v14 }
  0xf7   : > { %355 = vst.msk [vmem:[%s248_s9] sm:$0xff] %vm272_vm1, %v354_v15 }
  0xf8   : > { %621 = shalt.err (!%p618_p3)
}
  0xf9   : > { %s622_s26 = scalar_lea.hbm %s369_s13, 128  ;;  %s626_s5 = scalar_lea.hbm %s854_s4, 256 }
  0xfa   : > { %p623_p5 = scmp.ne.s32.totalorder %s369_s13, %s622_s26  ;;  %p627_p9 = scmp.lt.s32.totalorder %s369_s13, %s854_s4 }
  0xfb   : > { %p628_p12 = scmp.lt.s32.totalorder %s626_s5, %s622_s26 }
  0xfc   : > { %p624_p6 = pnand %p623_p5, %p762_p4 }
  0xfd   : > { %p629_p10 = por %p628_p12, %p627_p9 }
  0xfe   : > { %p625_p7 = pneg %p624_p6 }
 0x100   : > { %p630_p11 = pnand %p629_p10, %p625_p7 }
 0x102   : > { %633 = shalt.err (!%p630_p11)
}
 0x103   : > { %514 = dma.vmem_to_hbm [thread:$0]  (%p762_p4), %s372_s10, 128, %s369_s13, %s357_s14  }
 0x104 PF: > { %p526_p13 = scmp.ge.s32.totalorder %s688_s20, 2  ;;  %s383_s8 = sand.u32 1, %s668_s15  }
 0x105   : > { %s384_s9 = scalar_lea.sflag [#allocation4], %s383_s8 }
 0x106   : > { %p521_p0 = pnand %p526_p13, %p769_p8 }
 0x108   : > { %p522_p1 = pneg %p521_p0 }
 0x10a   : > { %663 = dma.done.wait (%p522_p1), %s384_s9, 128  }
 0x10b   : > { %665 = vsyncadd (%p522_p1), %s384_s9, 4294967168  ;;  %s18_s20 = sadd.s32 1, %s688_s20   ;;  %s859_s15 = smov %s672_s16 }
 0x10c   : > { %p15_p2 = scmp.ge.s32.totalorder %s18_s20, 4   ;;  %s860_s16 = smov %s676_s17 }
 0x10d   : > { %s861_s17 = smov %s775_s28  ;;  %s862_s18 = smov %s684_s19 }
 0x10e   : > { %s863_s19 = smov %s865_s23  ;;  %17 = sbr.rel (!%p15_p2) target bundleno = 5 (0x5), region = 83 }
 0x113   :  { %389 = vsyncpa [#allocation3], 1 }
 0x114   :  { %391 = vsyncpa [#allocation3 + $0x1], 1 }
 0x115   :  { %392 = vsyncpa [#allocation4], 1 }
 0x116   :  { %394 = vsyncpa [#allocation4 + $0x1], 1 }

</bundles_post_ra>
